<compile_context>
chip_gen: v7x
topology: tpu7x:2x2x1
jax: 0.10.0
libtpu: 0.0.40
codegen_flags: <defaults>
</compile_context>

<pallas_src>
import jax
import jax.numpy as jnp
from jax.experimental import pallas as pl
from jax.experimental.pallas import tpu as pltpu


def _ensemble_kernel(x_ref, w_ref, b_ref, o_ref, wsum_ref):
    # grid = (C_tiles, H); axis 1 (heads) is the sequential reduction axis.
    h = pl.program_id(1)
    num_heads = pl.num_programs(1)

    @pl.when(h == 0)
    def _():
        wsum_ref[...] = jnp.zeros_like(wsum_ref)

    # Pure VPU accumulate of this head's weight slab (no matmul per step).
    # w_ref: (1, D, TC)
    wsum_ref[...] += w_ref[0].astype(jnp.float32)

    @pl.when(h == num_heads - 1)
    def _():
        inv_h = 1.0 / num_heads
        w_mean = wsum_ref[...] * inv_h                       # (D, TC) f32
        b_mean = (
            jnp.sum(b_ref[...].astype(jnp.float32), axis=0, keepdims=True)
            * inv_h
        )                                                    # (1, TC) f32
        # Single MXU matmul with f32 accumulation.
        acc = jnp.dot(
            x_ref[...].astype(jnp.float32),
            w_mean,
            preferred_element_type=jnp.float32,
        )                                                    # (B_pad, TC)
        o_ref[...] = (acc + b_mean).astype(o_ref.dtype)


def ensemble_head(x, weights, biases):
    """Soft ensemble of linear heads.

    x:       [B, D]
    weights: [H, D, C]   (stacked per-head nn.Linear weights, transposed)
    biases:  [H, C]
    returns: [B, C]  = mean over heads of (x @ W_h + b_h)
    """
    B, D = x.shape
    H, Dw, C = weights.shape
    assert Dw == D and biases.shape == (H, C)

    LANE, SUB = 128, 8
    B_pad = ((B + SUB - 1) // SUB) * SUB
    C_pad = ((C + LANE - 1) // LANE) * LANE

    x_p = x if B_pad == B else jnp.pad(x, ((0, B_pad - B), (0, 0)))
    w_p = (
        weights
        if C_pad == C
        else jnp.pad(weights, ((0, 0), (0, 0), (0, C_pad - C)))
    )
    b_p = biases if C_pad == C else jnp.pad(biases, ((0, 0), (0, C_pad - C)))

    # Pick a lane-dense C tile (multiple of 128, capped so double-buffered W
    # slabs + scratch stay comfortably inside v7x's 64 MiB VMEM).
    tc = C_pad
    if tc > 512:
        for cand in (512, 384, 256, 128):
            if C_pad % cand == 0:
                tc = cand
                break
    num_c_tiles = C_pad // tc

    out_p = pl.pallas_call(
        _ensemble_kernel,
        out_shape=jax.ShapeDtypeStruct((B_pad, C_pad), x.dtype),
        grid_spec=pltpu.PrefetchScalarGridSpec(
            num_scalar_prefetch=0,
            grid=(num_c_tiles, H),
            in_specs=[
                # x: same block every step -> DMA'd once per core.
                pl.BlockSpec((B_pad, D), lambda j, h: (0, 0)),
                # W_h slab for this C tile.
                pl.BlockSpec((1, D, tc), lambda j, h: (h, 0, j)),
                # All heads' biases for this C tile (read once, reduced in epilogue).
                pl.BlockSpec((H, tc), lambda j, h: (0, j)),
            ],
            out_specs=pl.BlockSpec((B_pad, tc), lambda j, h: (0, j)),
            scratch_shapes=[pltpu.VMEM((D, tc), jnp.float32)],
        ),
        compiler_params=pltpu.CompilerParams(
            dimension_semantics=("parallel", "arbitrary"),
        ),
    )(x_p, w_p, b_p)

    return out_p[:B, :C]


if __name__ == "__main__":
    key = jax.random.PRNGKey(0)
    B, D, C, H = 8, 32, 16, 4  # batch, in_features, num_classes, num_heads

    kx, kw, kb = jax.random.split(key, 3)
    x = jax.random.normal(kx, (B, D), dtype=jnp.float32)
    # Deterministic per-head parameters (same shapes as H nn.Linear(D, C) heads).
    weights = jax.random.normal(kw, (H, D, C), dtype=jnp.float32) * 0.1
    biases = jax.random.normal(kb, (H, C), dtype=jnp.float32) * 0.1

    out = jax.block_until_ready(ensemble_head(x, weights, biases))

    # Pure-JAX reference (matches PyTorch: mean over stacked head outputs).
    ref = jnp.mean(
        jnp.stack([x @ weights[h] + biases[h] for h in range(H)], axis=1), axis=1
    )
    assert out.shape == (B, C)
    assert jnp.allclose(out, ref, atol=1e-5, rtol=1e-5), "mismatch vs reference"

    print("KERNEL_OK")
</pallas_src>

<mosaic_0001>
module attributes {stable_mosaic.version = 11 : i64} {
  func.func @_ensemble_kernel(%arg0: i32, %arg1: i32, %arg2: memref<8x32xf32, #tpu.memory_space<vmem>>, %arg3: memref<1x32x128xf32, #tpu.memory_space<vmem>>, %arg4: memref<4x128xf32, #tpu.memory_space<vmem>>, %arg5: memref<8x128xf32, #tpu.memory_space<vmem>>, %arg6: memref<32x128xf32, #tpu.memory_space<vmem>>) attributes {dimension_semantics = [#tpu.dimension_semantics<parallel>, #tpu.dimension_semantics<arbitrary>], iteration_bounds = array<i64: 1, 4>, scalar_prefetch = 0 : i64, scratch_operands = 1 : i64, tpu.core_type = #tpu.core_type<tc>, window_params = [{pipeline_mode = #tpu.pipeline_mode<synchronous>, transform_indices = @transform_0, window_bounds = array<i64: 8, 32>}, {transform_indices = @transform_1, window_bounds = array<i64: 1, 32, 128>}, {transform_indices = @transform_2, window_bounds = array<i64: 4, 128>}, {transform_indices = @transform_3, window_bounds = array<i64: 8, 128>}]} {
    %c0_i32 = arith.constant 0 : i32
    %0 = arith.cmpi eq, %arg1, %c0_i32 : i32
    %1 = arith.extui %0 : i1 to i32
    %c0_i32_0 = arith.constant 0 : i32
    %2 = arith.cmpi ne, %1, %c0_i32_0 : i32
    scf.if %2 {
      %cst = arith.constant 0.000000e+00 : f32
      %11 = vector.broadcast %cst : f32 to vector<32x128xf32>
      %c0_8 = arith.constant 0 : index
      %c0_9 = arith.constant 0 : index
      %12 = vector.load %arg6[%c0_8, %c0_9] : memref<32x128xf32, #tpu.memory_space<vmem>>, vector<32x128xf32>
      tpu.vector_store %arg6[%c0_8, %c0_9], %11 {strides = array<i32>} : memref<32x128xf32, #tpu.memory_space<vmem>>, vector<32x128xf32>,
    } else {
    }
    %c0 = arith.constant 0 : index
    %c0_1 = arith.constant 0 : index
    %3 = vector.load %arg6[%c0, %c0_1] : memref<32x128xf32, #tpu.memory_space<vmem>>, vector<32x128xf32>
    %c0_2 = arith.constant 0 : index
    %c0_3 = arith.constant 0 : index
    %c0_4 = arith.constant 0 : index
    %4 = vector.load %arg3[%c0_2, %c0_3, %c0_4] : memref<1x32x128xf32, #tpu.memory_space<vmem>>, vector<1x32x128xf32>
    %5 = vector.shape_cast %4 : vector<1x32x128xf32> to vector<32x128xf32>
    %6 = arith.addf %3, %5 : vector<32x128xf32>
    %c0_5 = arith.constant 0 : index
    %c0_6 = arith.constant 0 : index
    %7 = vector.load %arg6[%c0_5, %c0_6] : memref<32x128xf32, #tpu.memory_space<vmem>>, vector<32x128xf32>
    tpu.vector_store %arg6[%c0_5, %c0_6], %6 {strides = array<i32>} : memref<32x128xf32, #tpu.memory_space<vmem>>, vector<32x128xf32>,
    %c3_i32 = arith.constant 3 : i32
    %8 = arith.cmpi eq, %arg1, %c3_i32 : i32
    %9 = arith.extui %8 : i1 to i32
    %c0_i32_7 = arith.constant 0 : i32
    %10 = arith.cmpi ne, %9, %c0_i32_7 : i32
    scf.if %10 {
      %c0_8 = arith.constant 0 : index
      %c0_9 = arith.constant 0 : index
      %11 = vector.load %arg6[%c0_8, %c0_9] : memref<32x128xf32, #tpu.memory_space<vmem>>, vector<32x128xf32>
      %cst = arith.constant 2.500000e-01 : f32
      %12 = vector.broadcast %cst : f32 to vector<32x128xf32>
      %13 = arith.mulf %11, %12 : vector<32x128xf32>
      %c0_10 = arith.constant 0 : index
      %c0_11 = arith.constant 0 : index
      %14 = vector.load %arg4[%c0_10, %c0_11] : memref<4x128xf32, #tpu.memory_space<vmem>>, vector<4x128xf32>
      %cst_12 = arith.constant dense<0.000000e+00> : vector<128xf32>
      %15 = vector.multi_reduction <add>, %14, %cst_12 [0] : vector<4x128xf32> to vector<128xf32>
      %16 = vector.shape_cast %15 : vector<128xf32> to vector<1x128xf32>
      %cst_13 = arith.constant 2.500000e-01 : f32
      %17 = vector.broadcast %cst_13 : f32 to vector<1x128xf32>
      %18 = arith.mulf %16, %17 : vector<1x128xf32>
      %c0_14 = arith.constant 0 : index
      %c0_15 = arith.constant 0 : index
      %19 = vector.load %arg2[%c0_14, %c0_15] : memref<8x32xf32, #tpu.memory_space<vmem>>, vector<8x32xf32>
      %cst_16 = arith.constant dense<0.000000e+00> : vector<8x128xf32>
      %20 = tpu.matmul %19, %13, %cst_16 {dimension_numbers = #tpu.dot_dimension_numbers<[1], [0], [0], [1], [0, 0, 1, 1], [], []>} : vector<8x32xf32>, vector<32x128xf32>, vector<8x128xf32> -> vector<8x128xf32>
      %21 = vector.broadcast %18 : vector<1x128xf32> to vector<8x128xf32>
      %22 = arith.addf %20, %21 : vector<8x128xf32>
      %c0_17 = arith.constant 0 : index
      %c0_18 = arith.constant 0 : index
      %23 = vector.load %arg5[%c0_17, %c0_18] : memref<8x128xf32, #tpu.memory_space<vmem>>, vector<8x128xf32>
      tpu.vector_store %arg5[%c0_17, %c0_18], %22 {strides = array<i32>} : memref<8x128xf32, #tpu.memory_space<vmem>>, vector<8x128xf32>,
    } else {
    }
    return
  }
  func.func @transform_0(%arg0: i32, %arg1: i32) -> (i32, i32) {
    %c0_i32 = arith.constant 0 : i32
    %c0_i32_0 = arith.constant 0 : i32
    %c0_i32_1 = arith.constant 0 : i32
    return %c0_i32, %c0_i32_0 : i32, i32
  }
  func.func @transform_1(%arg0: i32, %arg1: i32) -> (i32, i32, i32) {
    %c0_i32 = arith.constant 0 : i32
    %c0_i32_0 = arith.constant 0 : i32
    return %arg1, %c0_i32, %arg0 : i32, i32, i32
  }
  func.func @transform_2(%arg0: i32, %arg1: i32) -> (i32, i32) {
    %c0_i32 = arith.constant 0 : i32
    %c0_i32_0 = arith.constant 0 : i32
    return %c0_i32, %arg0 : i32, i32
  }
  func.func @transform_3(%arg0: i32, %arg1: i32) -> (i32, i32) {
    %c0_i32 = arith.constant 0 : i32
    %c0_i32_0 = arith.constant 0 : i32
    return %c0_i32, %arg0 : i32, i32
  }
}

</mosaic_0001>

<bundles_post_ra>
// kernel: tpu_custom_call.1
= control target key start
LH: loop header
LB: loop body
LE: loop exit
PB: predicated region body
PF: predicated region fallthrough
CT: control target
= control target key end

     0   :  { %8 = vsyncpa [#allocation4], 0  ;;  %s941_s0 = inlined_call_operand.hbm [shape: f32[8,32], index: 0, kind: input, shape index: {}]   ;;  %s942_s1 = inlined_call_operand.hbm [shape: f32[4,32,128], index: 1, kind: input, shape index: {}]   ;;  %s943_s2 = inlined_call_operand.vmem [shape: f32[4,128], index: 2, kind: input, shape index: {}]   ;;  %s944_s3 = inlined_call_operand.hbm [shape: f32[8,128], index: 3, kind: output, shape index: {}]  }
   0x1   :  { %9 = vsyncpa [#allocation7], 0 }
   0x2   :  { %11 = vsyncpa [#allocation7 + $0x1], 0 }
   0x3   :  { %12 = vsyncpa [#allocation5], 0  ;;  %s741_s12 = smov 0   ;;  %s743_s13 = smov 0  }
   0x4   :  { %s745_s14 = smov 0   ;;  %s747_s15 = smov 0  }
   0x5   :  { %s749_s16 = smov 0   ;;  %s751_s17 = smov 0  }
   0x6 LB: > { %s448_s18 = sadd.s32 4294967295, %s710_s17   ;;  %s60_s19 = sadd.s32 1, %s698_s14  ;;  %s710_s17 = sphi %s751_s17, %s18_s17   ;;  %s706_s16 = sphi %s749_s16, %s965_s16   ;;  %s702_s15 = sphi %s747_s15, %s964_s15   ;;  %s698_s14 = sphi %s745_s14, %s963_s14   ;;  %s694_s13 = sphi %s743_s13, %s962_s13   ;;  %s690_s12 = sphi %s741_s12, %s961_s12  }
   0x7   : > { %p67_p0 = scmp.ne.s32.totalorder %s698_s14, %s694_s13  ;;  %p68_p1 = scmp.eq.s32.totalorder %s710_s17, 0 }
   0x8   : > { %p73_p2 = scmp.ne.s32.totalorder %s694_s13, %s690_s12  ;;  %p777_p3 = scmp.eq.s32.totalorder %s448_s18, 0 }
   0x9   : > { %p69_p4 = por %p68_p1, %p67_p0  ;;  %p449_p5 = scmp.ge.s32.totalorder %s710_s17, 1 }
   0xa   : > { %s950_s20 = scalar_select %p777_p3, 1, 0 }
   0xb   : > { %p784_p6 = por %p777_p3, %p73_p2  ;;  %p136_p7 = scmp.lt.s32.totalorder %s710_s17, 5 }
   0xc   : > { %s712_s23 = smov [#allocation3]   ;;  %p508_p10 = scmp.lt.s32.totalorder %s710_s17, 4 }
   0xd   : > { %s951_s21 = scalar_select %p784_p6, 1, 0 }
   0xe   : > { %p789_p8 = pnand %p449_p5, %p136_p7  ;;  %s149_s24 = sshll.u32 %s712_s23, 4  ;;  %s150_s24 = int_to_ptr.vmem [resolvable:$true] %s149_s24 }
   0xf   : > { %s167_s25 = sand.u32 1, %s698_s14   ;;  %p803_p12 = pnand %p508_p10, %p69_p4 }
  0x10   : > { %s952_s22 = scalar_select %p789_p8, 1, 0 }
  0x11   : > { %p499_p9 = pneg %p789_p8  ;;  %s568_s30 = scalar_lea.hbm %s941_s0, 128 }
  0x12   : > { %s954_s27 = scalar_select %p803_p12, 1, 0 }
  0x13   : > { %p799_p11 = pnand %p499_p9, %p777_p3  ;;  %p569_p13 = scmp.ne.s32.totalorder %s941_s0, %s568_s30 }
  0x14   : > { %p575_p5 = scmp.lt.u32.totalorder %s568_s30, %s941_s0 }
  0x15   : > { %p570_p0 = pneg %p799_p11 }
  0x17   : > { %p571_p1 = pnand %p570_p0, %p569_p13 }
  0x19   : > { %p572_p2 = pneg %p571_p1 }
  0x1b   : > { %p577_p4 = pnand %p575_p5, %p572_p2 }
  0x1d   : > { %580 = shalt.err (!%p577_p4)
}
  0x1e   : > { %s581_s8 = scalar_lea.vmem %s150_s24, 128  ;;  %p589_p6 = scmp.lt.s32.totalorder %s150_s24, %s150_s24 }
  0x1f   : > { %p582_p7 = scmp.ne.s32.totalorder %s150_s24, %s581_s8  ;;  %p590_p3 = scmp.lt.s32.totalorder %s581_s8, %s581_s8 }
  0x21   : > { %p584_p9 = pnand %p582_p7, %p570_p0  ;;  %p591_p8 = por %p590_p3, %p589_p6 }
  0x23   : > { %p585_p10 = pneg %p584_p9 }
  0x25   : > { %p592_p12 = pnand %p591_p8, %p585_p10 }
  0x27   : > { %595 = shalt.err (!%p592_p12)
}
  0x28   : > { %502 = dma.hbm_to_vmem [thread:$0]  (!%p799_p11), %s941_s0, 128, %s150_s24, [#allocation4]  }
  0x29   : > { %s27_s11 = sadd.s32 1, %s706_s16  ;;  %s453_s12 = sshll.u32 %s167_s25, 5 }
  0x2a   : > { %p28_p13 = scmp.ge.s32.totalorder %s27_s11, 4  ;;  %s466_s23 = sshll.u32 %s706_s16, 9 }
  0x2b   : > { %s171_s28 = scalar_lea.vmem [#allocation6], %s453_s12  ;;  %s832_s4 = scalar_lea.hbm %s942_s1, %s466_s23 }
  0x2c   : > { %s179_s29 = sshll.u32 %s171_s28, 4  ;;  %s967_s11 = smov (%p28_p13, %s27_s11), 0  ;;  %s834_s29 = int_to_ptr.vmem [resolvable:$true] %s179_s29 }
  0x2d   : > { %s55_s24 = ssub.s32 %s706_s16, %s967_s11  ;;  %s844_s6 = scalar_lea.sflag [#allocation7], %s167_s25 }
  0x2e   : > { %p838_p3 = scmp.eq.s32.totalorder %s55_s24, 0  ;;  %s596_s7 = scalar_lea.hbm %s832_s4, 512 }
  0x2f   : > { %p597_p6 = scmp.ne.s32.totalorder %s832_s4, %s596_s7  ;;  %p956_p8 = scmp.ne.s32.totalorder %s954_s27, 0 }
  0x30   : > { %s601_s10 = scalar_lea.hbm %s942_s1, 2048  ;;  %p602_p1 = scmp.lt.u32.totalorder %s832_s4, %s942_s1 }
  0x31   : > { %p598_p11 = pneg %p956_p8  ;;  %p603_p2 = scmp.lt.u32.totalorder %s601_s10, %s596_s7 }
  0x32   : > { %p605_p4 = scmp.lt.u32.totalorder %s596_s7, %s832_s4 }
  0x33   : > { %p599_p12 = pnand %p598_p11, %p597_p6  ;;  %p604_p5 = por %p603_p2, %p602_p1 }
  0x35   : > { %p600_p0 = pneg %p599_p12  ;;  %p606_p7 = por %p605_p4, %p604_p5 }
  0x37   : > { %p607_p9 = pnand %p606_p7, %p600_p0 }
  0x39   : > { %610 = shalt.err (!%p607_p9)
}
  0x3a   : > { %s611_s25 = scalar_lea.vmem %s834_s29, 512  ;;  %s713_s28 = smov [#allocation6]  }
  0x3b   : > { %p612_p10 = scmp.ne.s32.totalorder %s834_s29, %s611_s25  ;;  %s616_s26 = sshll.u32 %s713_s28, 4  ;;  %s617_s26 = int_to_ptr.vmem [resolvable:$false] %s616_s26 }
  0x3c   : > { %s618_s30 = scalar_lea.vmem %s617_s26, 1024  ;;  %p619_p12 = scmp.lt.s32.totalorder %s834_s29, %s617_s26 }
  0x3d   : > { %p614_p13 = pnand %p612_p10, %p598_p11  ;;  %p620_p1 = scmp.lt.s32.totalorder %s618_s30, %s611_s25 }
  0x3f   : > { %p615_p6 = pneg %p614_p13  ;;  %p621_p2 = por %p620_p1, %p619_p12 }
  0x41   : > { %p622_p5 = pnand %p621_p2, %p615_p6 }
  0x43   : > { %625 = shalt.err (!%p622_p5)
}
  0x44   : > { %s714_s24 = smov 128   ;;  %s715_s7 = smov 8  }
  0x45   : > { %506 = dma.hbm_to_vmem [thread:$0]  (!%p956_p8), %s832_s4, 512, %s834_s29, %s844_s6, %s714_s24, %s714_s24, %s715_s7  }
  0x46   : > { %s877_s8 = scalar_select %p838_p3, %s698_s14, %s60_s19  }
  0x47   : > { %p957_p11 = scmp.ne.s32.totalorder %s952_s22, 0 }
  0x48   : > { %p958_p0 = scmp.ne.s32.totalorder (!%p957_p11), %s950_s20, 0 }
  0x49   : > { %191 = sbr.rel (%p957_p11) target bundleno = 357 (0x165), region = 32 }
  0x50   : > { %677 = dma.done.wait (%p958_p0), [#allocation4], 128  }
  0x51   : > { %679 = vsyncadd (%p958_p0), [#allocation4], 4294967168  ;;  %s197_s9 = sand.u32 1, %s694_s13   ;;  %p959_p8 = scmp.ne.s32.totalorder %s951_s21, 0 }
  0x52   : > { %s458_s10 = sshll.u32 %s197_s9, 5  ;;  %s198_s12 = scalar_lea.sflag [#allocation7], %s197_s9 }
  0x53   : > { %s201_s27 = scalar_lea.vmem [#allocation6], %s458_s10 }
  0x54   : > { %681 = dma.done.wait (%p959_p8), %s198_s12, 512  }
  0x55   : > { %683 = vsyncadd (%p959_p8), %s198_s12, 4294966784  ;;  %p459_p3 = scmp.ne.s32.totalorder %s702_s15, 0 }
  0x56   : > { %v716_v0 = vmov (!%p459_p3), 0.0  }
  0x57   : > { %230 = sbr.rel (%p459_p3) target bundleno = 94 (0x5e), region = 44  ;;  %231 = vst [vmem:[#allocation2] sm:$0xff] (!%p459_p3), %v716_v0  ;;  %232 = vst [vmem:[#allocation2 + $0x8] sm:$0xff] (!%p459_p3), %v716_v0 }
  0x58   : > { %233 = vst [vmem:[#allocation2 + $0x10] sm:$0xff] (!%p459_p3), %v716_v0  ;;  %234 = vst [vmem:[#allocation2 + $0x18] sm:$0xff] (!%p459_p3), %v716_v0 }
  0x5e PF: > { %v235_v1 = vld [vmem:[#allocation2] sm:$0xff]  ;;  %v239_v2 = vld [vmem:[%s201_s27] sm:$0xff]  ;;  %v240_v5 = vld [vmem:[%s201_s27 + $0x8] sm:$0xff]  ;;  %p460_p4 = scmp.ne.s32.totalorder %s702_s15, 3 }
  0x5f   : > { %v236_v3 = vld [vmem:[#allocation2 + $0x8] sm:$0xff]  ;;  %v243_v4 = vadd.f32 %v239_v2, %v235_v1  ;;  %v237_v6 = vld [vmem:[#allocation2 + $0x10] sm:$0xff]  ;;  %v241_v7 = vld [vmem:[%s201_s27 + $0x10] sm:$0xff]  ;;  %v717_v16 = vmov (!%p460_p4), 0.0|0.0   ;;  %vm718_vm0 = vmmov (!%p460_p4), 0   ;;  %v719_v21 = vmov (!%p460_p4), 0.0  }
  0x60   : > { %v244_v8 = vadd.f32 %v240_v5, %v236_v3  ;;  %v245_v9 = vadd.f32 %v241_v7, %v237_v6  ;;  %v238_v10 = vld [vmem:[#allocation2 + $0x18] sm:$0xff]  ;;  %v242_v11 = vld [vmem:[%s201_s27 + $0x18] sm:$0xff]  ;;  %254 = sbr.rel (%p460_p4) target bundleno = 332 (0x14c), region = 48  ;;  %483 = vmatprep.subr.bf16.mxu0 (!%p460_p4), %v717_v16  ;;  %480 = vmatprep.mubr.msk.f32.mxu0 (!%p460_p4), %vm718_vm0, %v719_v21  ;;  %vm274_vm1 = vcmask (!%p460_p4), 261120   ;;  %vm264_vm2 = vcmask (!%p460_p4), 1043456  }
  0x61   : > { %247 = vst [vmem:[#allocation2] sm:$0xff] %v243_v4  ;;  %v246_v12 = vadd.f32 %v242_v11, %v238_v10  ;;  %v273_v25 = vld [vmem:[#allocation3] sm:$0xff] (!%p460_p4) }
  0x62   : > { %248 = vst [vmem:[#allocation2 + $0x8] sm:$0xff] %v244_v8  ;;  %249 = vst [vmem:[#allocation2 + $0x10] sm:$0xff] %v245_v9  ;;  %v263_v26 = vld [vmem:[%s943_s2] sm:$0xf] (!%p460_p4) }
  0x63   : > { %250 = vst [vmem:[#allocation2 + $0x18] sm:$0xff] %v246_v12  ;;  %v265_v27 = vsel (!%p460_p4), %vm264_vm2, %v263_v26, 0.0 }
  0x64   : > { %v266_v28 = vrot.slane (!%p460_p4), %v265_v27, 4 }
  0x66   : > { %v267_v29 = vadd.f32 (!%p460_p4), %v266_v28, %v265_v27 }
  0x68   : > { %v255_v13 = vld [vmem:[#allocation2] sm:$0xff]  ;;  %v268_v30 = vrot.slane %v267_v29, 2 }
  0x69   : > { %v256_v14 = vld [vmem:[#allocation2 + $0x8] sm:$0xff]  ;;  %v257_v15 = vld [vmem:[#allocation2 + $0x10] sm:$0xff]  ;;  %v259_v17 = vmul.f32 0.25, %v255_v13 }
  0x6a   : > { %v260_v18 = vmul.f32 0.25, %v256_v14  ;;  %v258_v19 = vld [vmem:[#allocation2 + $0x18] sm:$0xff]  ;;  %v261_v20 = vmul.f32 0.25, %v257_v15  ;;  %v269_v31 = vadd.f32 %v268_v30, %v267_v29 }
  0x6b   : > { %v262_v22 = vmul.f32 0.25, %v258_v19 }
  0x6c   : > { %v484_v23 = vpack.c.bf16 %v260_v18, %v259_v17  ;;  %v270_v32 = vrot.slane %v269_v31, 1 }
  0x6d   : > { %v487_v24 = vpack.c.bf16 %v262_v22, %v261_v20 }
  0x6e   : > { %485 = vmatpush3.bf16.msra.mxu0 %v484_v23  ;;  %v271_v33 = vadd.f32 %v270_v32, %v269_v31 }
  0x6f   : > { %486 = vmatprep.subr.bf16.mxu0 %v717_v16 }
  0x70   : > { %v272_v34 = vmul.f32 0.25, %v271_v33 }
  0x72   : > { %488 = vmatpush3.bf16.msra.mxu0 %v487_v24 }
  0x75   : > { %481 = vmatmul.mubr.msk.f32.vlgmr.msra.gmra.mrb[0].mxu0 %vm274_vm1, %v273_v25 }
 0x148   : > { %v344_v35 = vpop.f32.mrb[0].mxu0 }
 0x149   : > { %v345_v36 = vadd.f32 %v344_v35, %v272_v34  ;;  %v482_v37 = vpop.f32.mrb[1].mxu0 }
 0x14b   : > { %348 = vst [vmem:[#allocation8] sm:$0xff] %v345_v36 }
 0x14c PF: > { %p897_p7 = scmp.eq.s32.totalorder %s448_s18, 3  ;;  %s720_s21 = smov [#allocation8]  }
 0x14d   : > { %s358_s22 = sshll.u32 %s720_s21, 4  ;;  %s359_s22 = int_to_ptr.vmem [resolvable:$true] %s358_s22 }
 0x14e   : > { %s626_s29 = scalar_lea.vmem %s359_s22, 128  ;;  %p633_p6 = scmp.lt.s32.totalorder %s359_s22, %s359_s22 }
 0x14f   : > { %p627_p9 = scmp.ne.s32.totalorder %s359_s22, %s626_s29  ;;  %p634_p12 = scmp.lt.s32.totalorder %s626_s29, %s626_s29 }
 0x151   : > { %p628_p10 = pnand %p627_p9, %p897_p7  ;;  %p635_p1 = por %p634_p12, %p633_p6 }
 0x153   : > { %p629_p13 = pneg %p628_p10 }
 0x155   : > { %p636_p2 = pnand %p635_p1, %p629_p13 }
 0x157   : > { %639 = shalt.err (!%p636_p2)
}
 0x158   : > { %s640_s18 = scalar_lea.hbm %s944_s3, 128 }
 0x159   : > { %p641_p5 = scmp.ne.s32.totalorder %s944_s3, %s640_s18  ;;  %p646_p8 = scmp.lt.u32.totalorder %s640_s18, %s944_s3 }
 0x15b   : > { %p642_p11 = pnand %p641_p5, %p897_p7 }
 0x15d   : > { %p643_p0 = pneg %p642_p11 }
 0x15f   : > { %p648_p3 = pnand %p646_p8, %p643_p0 }
 0x161   : > { %651 = shalt.err (!%p648_p3)
}
 0x162   : > { %496 = dma.vmem_to_hbm [thread:$0]  (%p897_p7), %s359_s22, 128, %s944_s3, [#allocation5]  }
 0x163   : > { %685 = dma.done.wait (%p897_p7), [#allocation5], 128  }
 0x164   : > { %687 = vsyncadd (%p897_p7), [#allocation5], 4294967168 }
 0x165 PF: > { %s18_s17 = sadd.s32 1, %s710_s17   ;;  %s961_s12 = smov %s694_s13 }
 0x166   : > { %p15_p4 = scmp.ge.s32.totalorder %s18_s17, 6   ;;  %s962_s13 = smov %s698_s14 }
 0x167   : > { %s963_s14 = smov %s877_s8  ;;  %s964_s15 = smov %s706_s16 }
 0x168   : > { %s965_s16 = smov %s967_s11  ;;  %17 = sbr.rel (!%p15_p4) target bundleno = 6 (0x6), region = 86 }
 0x16f   :  { %371 = vsyncpa [#allocation4], 1 }
 0x170   :  { %373 = vsyncpa [#allocation4 + $0x1], 1 }
 0x171   :  { %374 = vsyncpa [#allocation7], 1 }
 0x172   :  { %376 = vsyncpa [#allocation7 + $0x1], 1 }
 0x173   :  { %377 = vsyncpa [#allocation5], 1 }
 0x174   :  { %379 = vsyncpa [#allocation5 + $0x1], 1 }

</bundles_post_ra>
